<compile_context>
chip_gen: v7x
topology: tpu7x:2x2x1
jax: 0.10.0
libtpu: 0.0.40
codegen_flags: <defaults>
</compile_context>

<pallas_src>
import functools

import jax
import jax.numpy as jnp
from jax import lax
from jax.experimental import pallas as pl
from jax.experimental.pallas import tpu as pltpu


def _const_spec(arr):
    nd = arr.ndim
    return pl.BlockSpec(arr.shape, lambda *_, _nd=nd: (0,) * _nd)


def _attention_from_mean(mean_col, v1_ref, c1_ref, v2_ref, c2_ref):
    """Folded conv1 -> conv2 -> sigmoid on the per-sample channel mean (C, 1)."""
    h = jnp.dot(v1_ref[...], mean_col, preferred_element_type=jnp.float32) + c1_ref[...]
    z = jnp.dot(v2_ref[...], h, preferred_element_type=jnp.float32) + c2_ref[...]
    return 1.0 / (1.0 + jnp.exp(-z))                                      # (C, 1) f32


# ---------------------------------------------------------------------------
# Fused single-pass kernel: per-sample slab resident in VMEM.
# ---------------------------------------------------------------------------
def _fused_kernel(x_ref, v1_ref, c1_ref, v2_ref, c2_ref, o_ref, *, spatial_size):
    xf = x_ref[0].astype(jnp.float32)                                     # (C, S)
    mean_col = jnp.sum(xf, axis=-1, keepdims=True) * (1.0 / spatial_size)  # (C, 1)
    attn = _attention_from_mean(mean_col, v1_ref, c1_ref, v2_ref, c2_ref)
    o_ref[0] = x_ref[0] * attn.astype(o_ref.dtype)


# ---------------------------------------------------------------------------
# Kernel 1 (two-pass path): spatial mean + folded 1x1x1 convs + sigmoid.
# ---------------------------------------------------------------------------
def _mean_attn_kernel(x_ref, v1_ref, c1_ref, v2_ref, c2_ref, attn_ref, acc,
                      *, spatial_size, tile_s, unroll, ragged):
    k = pl.program_id(1)

    @pl.when(k == 0)
    def _init():
        acc[...] = jnp.zeros_like(acc)

    n_chunks = tile_s // 128

    def full_body(j, carry):
        # Unmasked steady state: one (C,128) lane-dense load + add per chunk.
        start = pl.multiple_of(j * 128, 128)
        acc[...] += x_ref[0, :, pl.ds(start, 128)].astype(jnp.float32)
        return carry

    if not ragged:
        lax.fori_loop(0, n_chunks, full_body, 0, unroll=unroll)
    else:
        base = k * tile_s
        is_ragged_tile = (base + tile_s) > spatial_size

        @pl.when(jnp.logical_not(is_ragged_tile))
        def _full_tile():
            lax.fori_loop(0, n_chunks, full_body, 0, unroll=unroll)

        @pl.when(is_ragged_tile)
        def _ragged_tile():
            # Only the single ragged last tile pays for the mask, and its trip
            # count is capped so fully-OOB chunks are skipped entirely.
            valid = spatial_size - base
            lane = lax.broadcasted_iota(jnp.int32, (1, 128), 1)

            def masked_body(j, carry):
                start = pl.multiple_of(j * 128, 128)
                chunk = x_ref[0, :, pl.ds(start, 128)].astype(jnp.float32)
                acc[...] += jnp.where(start + lane < valid, chunk, 0.0)
                return carry

            lax.fori_loop(0, pl.cdiv(valid, 128), masked_body, 0)

    @pl.when(k == pl.num_programs(1) - 1)
    def _finalize():
        # Single cross-lane (XLU) reduce, then the tiny folded convs + sigmoid.
        mean_col = jnp.sum(acc[...], axis=-1, keepdims=True) * (1.0 / spatial_size)
        attn = _attention_from_mean(mean_col, v1_ref, c1_ref, v2_ref, c2_ref)
        attn_ref[...] = attn[None, :, :].astype(attn_ref.dtype)           # (1, C, 1)


# ---------------------------------------------------------------------------
# Kernel 2 (two-pass path): y = x * attn (native-dtype multiply).
# ---------------------------------------------------------------------------
def _scale_kernel(attn_ref, x_ref, o_ref):
    a = attn_ref[...].astype(x_ref.dtype)                                 # (1, C, 1)
    o_ref[...] = x_ref[...] * a


def spatial_attention_forward(x, params, *,
                              mean_tile_bytes=4 * 1024 * 1024,
                              scale_tile_bytes=2 * 1024 * 1024,
                              fused_slab_bytes=4 * 1024 * 1024,
                              vmem_limit_bytes=32 * 1024 * 1024,
                              force_two_pass=False,
                              donate_x=False):
    N, C, D, H, W = x.shape
    S = D * H * W
    x3 = x.reshape(N, C, S)
    v1, c1, v2, c2 = params
    itemsize = jnp.dtype(x.dtype).itemsize

    # ---------------- Fused single-pass path ----------------
    if (not force_two_pass) and C * S * itemsize <= fused_slab_bytes:
        fused = functools.partial(_fused_kernel, spatial_size=S)
        y = pl.pallas_call(
            fused,
            out_shape=jax.ShapeDtypeStruct((N, C, S), x.dtype),
            grid_spec=pltpu.PrefetchScalarGridSpec(
                num_scalar_prefetch=0,
                grid=(N,),
                in_specs=[pl.BlockSpec((1, C, S), lambda n: (n, 0, 0)),
                          _const_spec(v1), _const_spec(c1),
                          _const_spec(v2), _const_spec(c2)],
                out_specs=pl.BlockSpec((1, C, S), lambda n: (n, 0, 0)),
            ),
            compiler_params=pltpu.CompilerParams(
                dimension_semantics=("parallel",),
                vmem_limit_bytes=vmem_limit_bytes),
            input_output_aliases=({0: 0} if donate_x else {}),
        )(x3, v1, c1, v2, c2)
        return y.reshape(N, C, D, H, W)

    # ---------------- Two-pass path ----------------
    s_pad = ((S + 127) // 128) * 128

    def lane_tile(nbytes):
        t = max(128, (nbytes // (C * itemsize)) // 128 * 128)
        return min(t, s_pad)

    ts1 = lane_tile(mean_tile_bytes)    # reduction pass streams only x (2 buffers)
    ts2 = lane_tile(scale_tile_bytes)   # scale pass streams x in + y out (4 buffers)
    nk1 = pl.cdiv(S, ts1)
    nk2 = pl.cdiv(S, ts2)
    unroll = min(ts1 // 128, 8)
    ragged = (S % ts1) != 0

    mean_kernel = functools.partial(
        _mean_attn_kernel, spatial_size=S, tile_s=ts1, unroll=unroll, ragged=ragged)

    attn = pl.pallas_call(
        mean_kernel,
        out_shape=jax.ShapeDtypeStruct((N, C, 1), jnp.float32),
        grid_spec=pltpu.PrefetchScalarGridSpec(
            num_scalar_prefetch=0,
            grid=(N, nk1),
            in_specs=[pl.BlockSpec((1, C, ts1), lambda n, k: (n, 0, k)),
                      _const_spec(v1), _const_spec(c1),
                      _const_spec(v2), _const_spec(c2)],
            out_specs=pl.BlockSpec((1, C, 1), lambda n, k: (n, 0, 0)),
            scratch_shapes=[pltpu.VMEM((C, 128), jnp.float32)],  # lane-dense accumulator
        ),
        compiler_params=pltpu.CompilerParams(
            dimension_semantics=("parallel", "arbitrary"),
            vmem_limit_bytes=vmem_limit_bytes),
    )(x3, v1, c1, v2, c2)

    # Ragged last spatial block: garbage lanes are multiplied but the OOB
    # write-back is clipped by Pallas (documented behavior), so nothing leaks.
    y = pl.pallas_call(
        _scale_kernel,
        out_shape=jax.ShapeDtypeStruct((N, C, S), x.dtype),
        grid_spec=pltpu.PrefetchScalarGridSpec(
            num_scalar_prefetch=0,
            grid=(N, nk2),
            in_specs=[pl.BlockSpec((1, C, 1), lambda n, k: (n, 0, 0)),
                      pl.BlockSpec((1, C, ts2), lambda n, k: (n, 0, k))],
            out_specs=pl.BlockSpec((1, C, ts2), lambda n, k: (n, 0, k)),
        ),
        compiler_params=pltpu.CompilerParams(
            dimension_semantics=("parallel", "parallel"),
            vmem_limit_bytes=vmem_limit_bytes),
        input_output_aliases=({1: 0} if donate_x else {}),
    )(attn, x3)

    return y.reshape(N, C, D, H, W)


def init_params(key, C=64, reduction_ratio=8, dtype=jnp.float32):
    """Deterministic synthetic parameters matching SpatialAttention's shapes,
    with eval-mode BatchNorm folded into the 1x1x1 conv weights."""
    Cs = C // reduction_ratio
    ks = jax.random.split(key, 10)

    v1 = 0.1 * jax.random.normal(ks[0], (Cs, C), dtype)      # conv1 weight (no bias)
    g1 = 1.0 + 0.1 * jax.random.normal(ks[1], (Cs,), dtype)  # bn1 gamma
    be1 = 0.1 * jax.random.normal(ks[2], (Cs,), dtype)       # bn1 beta
    m1 = 0.1 * jax.random.normal(ks[3], (Cs,), dtype)        # bn1 running mean
    var1 = jnp.abs(jax.random.normal(ks[4], (Cs,), dtype)) + 0.5

    v2 = 0.1 * jax.random.normal(ks[5], (C, Cs), dtype)      # conv2 weight (no bias)
    g2 = 1.0 + 0.1 * jax.random.normal(ks[6], (C,), dtype)
    be2 = 0.1 * jax.random.normal(ks[7], (C,), dtype)
    m2 = 0.1 * jax.random.normal(ks[8], (C,), dtype)
    var2 = jnp.abs(jax.random.normal(ks[9], (C,), dtype)) + 0.5

    eps = 1e-5
    s1 = g1 / jnp.sqrt(var1 + eps)
    v1_eff = v1 * s1[:, None]                 # (Cs, C)
    c1 = (be1 - m1 * s1).reshape(Cs, 1)       # (Cs, 1)
    s2 = g2 / jnp.sqrt(var2 + eps)
    v2_eff = v2 * s2[:, None]                 # (C, Cs)
    c2 = (be2 - m2 * s2).reshape(C, 1)        # (C, 1)
    return v1_eff, c1, v2_eff, c2


def spatial_attention_reference(x, params):
    """Pure-JAX reference of the PyTorch forward (BN folded as above)."""
    v1, c1, v2, c2 = params
    N, C = x.shape[:2]
    xf = x.astype(jnp.float32).reshape(N, C, -1)
    mean = xf.mean(axis=-1)                                   # (N, C)
    h = mean @ v1.T + c1[:, 0][None, :]                       # (N, Cs)
    z = h @ v2.T + c2[:, 0][None, :]                          # (N, C)
    attn = jax.nn.sigmoid(z)
    y = x.astype(jnp.float32) * attn[:, :, None, None, None]
    return y.astype(x.dtype)


if __name__ == "__main__":
    key = jax.random.PRNGKey(0)
    kx, kp = jax.random.split(key)

    # channel must be divisible by reduction_ratio=8; S = 189 exercises the
    # ragged (non-128-multiple) spatial path.
    N, C, D, H, W = 2, 64, 3, 7, 9
    x = jax.random.normal(kx, (N, C, D, H, W), jnp.float32)
    params = init_params(kp, C=C)

    ref = spatial_attention_reference(x, params)

    out_fused = spatial_attention_forward(x, params)                        # fused path
    out_2pass = spatial_attention_forward(x, params, force_two_pass=True)   # two-pass path
    jax.block_until_ready((out_fused, out_2pass))

    for out in (out_fused, out_2pass):
        assert out.shape == (N, C, D, H, W)
        err = float(jnp.max(jnp.abs(out - ref)))
        assert jnp.allclose(out, ref, rtol=1e-4, atol=1e-4), err
    print("KERNEL_OK")
</pallas_src>

<mosaic_0001>
module attributes {stable_mosaic.version = 11 : i64} {
  func.func @_fused_kernel(%arg0: i32, %arg1: memref<1x64x189xf32, #tpu.memory_space<vmem>>, %arg2: memref<8x64xf32, #tpu.memory_space<vmem>>, %arg3: memref<8x1xf32, #tpu.memory_space<vmem>>, %arg4: memref<64x8xf32, #tpu.memory_space<vmem>>, %arg5: memref<64x1xf32, #tpu.memory_space<vmem>>, %arg6: memref<1x64x189xf32, #tpu.memory_space<vmem>>) attributes {dimension_semantics = [#tpu.dimension_semantics<parallel>], iteration_bounds = array<i64: 2>, scalar_prefetch = 0 : i64, scratch_operands = 0 : i64, tpu.core_type = #tpu.core_type<tc>, window_params = [{transform_indices = @transform_0, window_bounds = array<i64: 1, 64, 189>}, {pipeline_mode = #tpu.pipeline_mode<synchronous>, transform_indices = @transform_1, window_bounds = array<i64: 8, 64>}, {pipeline_mode = #tpu.pipeline_mode<synchronous>, transform_indices = @transform_2, window_bounds = array<i64: 8, 1>}, {pipeline_mode = #tpu.pipeline_mode<synchronous>, transform_indices = @transform_3, window_bounds = array<i64: 64, 8>}, {pipeline_mode = #tpu.pipeline_mode<synchronous>, transform_indices = @transform_4, window_bounds = array<i64: 64, 1>}, {transform_indices = @transform_5, window_bounds = array<i64: 1, 64, 189>}]} {
    %c0 = arith.constant 0 : index
    %c0_0 = arith.constant 0 : index
    %c0_1 = arith.constant 0 : index
    %0 = vector.load %arg1[%c0, %c0_0, %c0_1] : memref<1x64x189xf32, #tpu.memory_space<vmem>>, vector<1x64x189xf32>
    %1 = vector.shape_cast %0 : vector<1x64x189xf32> to vector<64x189xf32>
    %cst = arith.constant dense<0.000000e+00> : vector<64xf32>
    %2 = vector.multi_reduction <add>, %1, %cst [1] : vector<64x189xf32> to vector<64xf32>
    %3 = vector.shape_cast %2 : vector<64xf32> to vector<64x1xf32>
    %cst_2 = arith.constant 0.00529100513 : f32
    %4 = vector.broadcast %cst_2 : f32 to vector<64x1xf32>
    %5 = arith.mulf %3, %4 : vector<64x1xf32>
    %c0_3 = arith.constant 0 : index
    %c0_4 = arith.constant 0 : index
    %6 = vector.load %arg2[%c0_3, %c0_4] : memref<8x64xf32, #tpu.memory_space<vmem>>, vector<8x64xf32>
    %cst_5 = arith.constant dense<0.000000e+00> : vector<8x1xf32>
    %7 = tpu.matmul %6, %5, %cst_5 {dimension_numbers = #tpu.dot_dimension_numbers<[1], [0], [0], [1], [0, 0, 1, 1], [], []>} : vector<8x64xf32>, vector<64x1xf32>, vector<8x1xf32> -> vector<8x1xf32>
    %c0_6 = arith.constant 0 : index
    %c0_7 = arith.constant 0 : index
    %8 = vector.load %arg3[%c0_6, %c0_7] : memref<8x1xf32, #tpu.memory_space<vmem>>, vector<8x1xf32>
    %9 = arith.addf %7, %8 : vector<8x1xf32>
    %c0_8 = arith.constant 0 : index
    %c0_9 = arith.constant 0 : index
    %10 = vector.load %arg4[%c0_8, %c0_9] : memref<64x8xf32, #tpu.memory_space<vmem>>, vector<64x8xf32>
    %cst_10 = arith.constant dense<0.000000e+00> : vector<64x1xf32>
    %11 = tpu.matmul %10, %9, %cst_10 {dimension_numbers = #tpu.dot_dimension_numbers<[1], [0], [0], [1], [0, 0, 1, 1], [], []>} : vector<64x8xf32>, vector<8x1xf32>, vector<64x1xf32> -> vector<64x1xf32>
    %c0_11 = arith.constant 0 : index
    %c0_12 = arith.constant 0 : index
    %12 = vector.load %arg5[%c0_11, %c0_12] : memref<64x1xf32, #tpu.memory_space<vmem>>, vector<64x1xf32>
    %13 = arith.addf %11, %12 : vector<64x1xf32>
    %cst_13 = arith.constant 0.000000e+00 : f32
    %14 = vector.broadcast %cst_13 : f32 to vector<64x1xf32>
    %15 = arith.subf %14, %13 : vector<64x1xf32>
    %16 = math.exp %15 : vector<64x1xf32>
    %cst_14 = arith.constant 1.000000e+00 : f32
    %17 = vector.broadcast %cst_14 : f32 to vector<64x1xf32>
    %18 = arith.addf %17, %16 : vector<64x1xf32>
    %cst_15 = arith.constant 1.000000e+00 : f32
    %19 = vector.broadcast %cst_15 : f32 to vector<64x1xf32>
    %20 = arith.divf %19, %18 : vector<64x1xf32>
    %c0_16 = arith.constant 0 : index
    %c0_17 = arith.constant 0 : index
    %c0_18 = arith.constant 0 : index
    %21 = vector.load %arg1[%c0_16, %c0_17, %c0_18] : memref<1x64x189xf32, #tpu.memory_space<vmem>>, vector<1x64x189xf32>
    %22 = vector.shape_cast %21 : vector<1x64x189xf32> to vector<64x189xf32>
    %23 = vector.broadcast %20 : vector<64x1xf32> to vector<64x189xf32>
    %24 = arith.mulf %22, %23 : vector<64x189xf32>
    %c0_19 = arith.constant 0 : index
    %c0_20 = arith.constant 0 : index
    %c0_21 = arith.constant 0 : index
    %25 = vector.load %arg6[%c0_19, %c0_20, %c0_21] : memref<1x64x189xf32, #tpu.memory_space<vmem>>, vector<1x64x189xf32>
    %26 = vector.shape_cast %25 : vector<1x64x189xf32> to vector<64x189xf32>
    %27 = vector.shape_cast %24 : vector<64x189xf32> to vector<1x64x189xf32>
    tpu.vector_store %arg6[%c0_19, %c0_20, %c0_21], %27 {strides = array<i32>} : memref<1x64x189xf32, #tpu.memory_space<vmem>>, vector<1x64x189xf32>,
    return
  }
  func.func @transform_0(%arg0: i32) -> (i32, i32, i32) {
    %c0_i32 = arith.constant 0 : i32
    %c0_i32_0 = arith.constant 0 : i32
    %c0_i32_1 = arith.constant 0 : i32
    return %arg0, %c0_i32, %c0_i32_0 : i32, i32, i32
  }
  func.func @transform_1(%arg0: i32) -> (i32, i32) {
    %c0_i32 = arith.constant 0 : i32
    %c0_i32_0 = arith.constant 0 : i32
    %c0_i32_1 = arith.constant 0 : i32
    return %c0_i32, %c0_i32_0 : i32, i32
  }
  func.func @transform_2(%arg0: i32) -> (i32, i32) {
    %c0_i32 = arith.constant 0 : i32
    %c0_i32_0 = arith.constant 0 : i32
    %c0_i32_1 = arith.constant 0 : i32
    return %c0_i32, %c0_i32_0 : i32, i32
  }
  func.func @transform_3(%arg0: i32) -> (i32, i32) {
    %c0_i32 = arith.constant 0 : i32
    %c0_i32_0 = arith.constant 0 : i32
    %c0_i32_1 = arith.constant 0 : i32
    return %c0_i32, %c0_i32_0 : i32, i32
  }
  func.func @transform_4(%arg0: i32) -> (i32, i32) {
    %c0_i32 = arith.constant 0 : i32
    %c0_i32_0 = arith.constant 0 : i32
    %c0_i32_1 = arith.constant 0 : i32
    return %c0_i32, %c0_i32_0 : i32, i32
  }
  func.func @transform_5(%arg0: i32) -> (i32, i32, i32) {
    %c0_i32 = arith.constant 0 : i32
    %c0_i32_0 = arith.constant 0 : i32
    %c0_i32_1 = arith.constant 0 : i32
    return %arg0, %c0_i32, %c0_i32_0 : i32, i32, i32
  }
}

</mosaic_0001>

<bundles_post_ra>
// kernel: tpu_custom_call.1
= control target key start
LH: loop header
LB: loop body
LE: loop exit
PB: predicated region body
PF: predicated region fallthrough
CT: control target
= control target key end

     0   :  { %10 = vsyncpa [#allocation3], 0  ;;  %s1388_s0 = inlined_call_operand.hbm [shape: f32[2,64,189], index: 0, kind: input, shape index: {}]   ;;  %s1389_s1 = inlined_call_operand.vmem [shape: f32[8,64], index: 1, kind: input, shape index: {}]   ;;  %s1390_s2 = inlined_call_operand.vmem [shape: f32[8,1], index: 2, kind: input, shape index: {}]   ;;  %s1391_s3 = inlined_call_operand.vmem [shape: f32[64,8], index: 3, kind: input, shape index: {}]   ;;  %s1392_s4 = inlined_call_operand.vmem [shape: f32[64,1], index: 4, kind: input, shape index: {}]   ;;  %s1393_s5 = inlined_call_operand.hbm [shape: f32[2,64,189], index: 5, kind: output, shape index: {}]  }
   0x1   :  { %12 = vsyncpa [#allocation3 + $0x1], 0 }
   0x2   :  { %13 = vsyncpa [#allocation4], 0 }
   0x3   :  { %15 = vsyncpa [#allocation4 + $0x1], 0  ;;  %s1043_s18 = smov 0   ;;  %s1045_s19 = smov 0  }
   0x4   :  { %s1047_s20 = smov 0   ;;  %s1049_s21 = smov 0  }
   0x5 LB: > { %s1064_s22 = sadd.s32 4294967295, %s1001_s21   ;;  %s729_s23 = sadd.s32 4294967294, %s1001_s21   ;;  %s1001_s21 = sphi %s1049_s21, %s1406_s21   ;;  %s997_s20 = sphi %s1047_s20, %s1405_s20   ;;  %s993_s19 = sphi %s1045_s19, %s1404_s19   ;;  %s989_s18 = sphi %s1043_s18, %s1403_s18  }
   0x6   : > { %s1068_s24 = sadd.s32 1, %s1001_s21   ;;  %s28_s25 = sadd.s32 1, %s997_s20 }
   0x7   : > { %s25_s26 = ssub.s32 %s1001_s21, %s1068_s24  ;;  %p35_p0 = scmp.ne.s32.totalorder %s997_s20, %s993_s19 }
   0x8   : > { %p26_p1 = scmp.eq.s32.totalorder %s25_s26, 0  ;;  %p36_p2 = scmp.eq.s32.totalorder %s1001_s21, 0 }
   0x9   : > { %p41_p3 = scmp.ne.s32.totalorder %s993_s19, %s989_s18  ;;  %p42_p4 = scmp.eq.s32.totalorder %s1064_s22, 0 }
   0xa   : > { %s1080_s27 = scalar_select %p26_p1, %s997_s20, %s28_s25  }
   0xb   : > { %p1082_p5 = por %p36_p2, %p35_p0  ;;  %p1086_p6 = por %p42_p4, %p41_p3 }
   0xc   : > { %p149_p7 = scmp.eq.s32.totalorder %s1064_s22, 1  ;;  %p155_p8 = scmp.eq.s32.totalorder %s729_s23, 1 }
   0xd   : > { %p829_p10 = scmp.lt.s32.totalorder %s1001_s21, 2  ;;  %s187_s7 = sand.u32 1, %s997_s20  }
   0xe   : > { %p1093_p11 = por %p149_p7, %p35_p0  ;;  %p1097_p12 = por %p155_p8, %p41_p3 }
   0xf   : > { %s752_s8 = sshll.u32 %s1001_s21, 11  ;;  %s732_s9 = sshll.u32 %s187_s7, 7 }
  0x10   : > { %s1397_s30 = scalar_select %p1093_p11, 1, 0 }
  0x11   : > { %s1398_s6 = scalar_select %p1097_p12, 1, 0 }
  0x12   : > { %s1106_s12 = scalar_lea.hbm %s1388_s0, %s752_s8  ;;  %s191_s13 = scalar_lea.vmem [#allocation2], %s732_s9 }
  0x13   : > { %s198_s14 = sshll.u32 %s191_s13, 4  ;;  %p1110_p13 = pnand %p829_p10, %p1082_p5  ;;  %s1114_s14 = int_to_ptr.vmem [resolvable:$true] %s198_s14 }
  0x14   : > { %s1116_s16 = scalar_lea.sflag [#allocation3], %s187_s7  ;;  %s905_s17 = scalar_lea.hbm %s1106_s12, 2048 }
  0x15   : > { %p906_p0 = scmp.ne.s32.totalorder %s1106_s12, %s905_s17  ;;  %p907_p1 = pneg %p1110_p13 }
  0x16   : > { %s910_s26 = scalar_lea.hbm %s1388_s0, 4096  ;;  %p911_p4 = scmp.lt.u32.totalorder %s1106_s12, %s1388_s0 }
  0x17   : > { %p908_p2 = pnand %p907_p1, %p906_p0  ;;  %p912_p5 = scmp.lt.u32.totalorder %s910_s26, %s905_s17 }
  0x18   : > { %p914_p8 = scmp.lt.u32.totalorder %s905_s17, %s1106_s12 }
  0x19   : > { %p909_p3 = pneg %p908_p2  ;;  %p913_p7 = por %p912_p5, %p911_p4 }
  0x1b   : > { %p915_p10 = por %p914_p8, %p913_p7 }
  0x1d   : > { %p916_p9 = pnand %p915_p10, %p909_p3 }
  0x1f   : > { %919 = shalt.err (!%p916_p9)
}
  0x20   : > { %s920_s7 = scalar_lea.vmem %s1114_s14, 2048  ;;  %s1003_s9 = smov [#allocation2]  }
  0x21   : > { %p921_p0 = scmp.ne.s32.totalorder %s1114_s14, %s920_s7  ;;  %s925_s10 = sshll.u32 %s1003_s9, 4  ;;  %s926_s10 = int_to_ptr.vmem [resolvable:$false] %s925_s10 }
  0x22   : > { %s927_s11 = scalar_lea.vmem %s926_s10, 4096  ;;  %p928_p11 = scmp.lt.s32.totalorder %s1114_s14, %s926_s10 }
  0x23   : > { %p923_p2 = pnand %p921_p0, %p907_p1  ;;  %p929_p4 = scmp.lt.s32.totalorder %s927_s11, %s920_s7 }
  0x25   : > { %p924_p12 = pneg %p923_p2  ;;  %p930_p5 = por %p929_p4, %p928_p11 }
  0x27   : > { %p931_p7 = pnand %p930_p5, %p924_p12 }
  0x29   : > { %934 = shalt.err (!%p931_p7)
}
  0x2a   : > { %s1004_s13 = smov 256   ;;  %s1005_s17 = smov 16  }
  0x2b   : > { %824 = dma.hbm_to_vmem [thread:$0]  (!%p1110_p13), %s1106_s12, 2048, %s1114_s14, %s1116_s16, %s1004_s13, %s1004_s13, %s1005_s17  }
  0x2c   : > { %p735_p9 = scmp.ge.s32.totalorder %s1001_s21, 1  ;;  %p206_p1 = scmp.lt.s32.totalorder %s1001_s21, 3 }
  0x2e   : > { %p207_p3 = pnand %p735_p9, %p206_p1 }
  0x2f   : > { %s1147_s23 = sand.u32 (!%p207_p3), 1, %s993_s19  }
  0x30   : > { %210 = sbr.rel (%p207_p3) target bundleno = 853 (0x355), region = 40  ;;  %s736_s25 = sshll.u32 (!%p207_p3), %s1147_s23, 7 }
  0x31   : > { %s213_s26 = scalar_lea.sflag (!%p207_p3), [#allocation3], %s1147_s23  ;;  %s1153_s28 = scalar_lea.vmem (!%p207_p3), [#allocation2], %s736_s25 }
  0x37   : > { %980 = dma.done.wait (%p1086_p6), %s213_s26, 2048  }
  0x38   : > { %982 = vsyncadd (%p1086_p6), %s213_s26, 4294965248  ;;  %vm259_vm0 = vcmask 498688   ;;  %v1160_v0 = vld [vmem:[%s1153_s28 + $0x20] sm:$0xff]  ;;  %v1163_v1 = vld [vmem:[%s1153_s28 + $0x28] sm:$0xff]  ;;  %v1006_v32 = vmov 0.0|0.0   ;;  %vm1007_vm1 = vmmov 0  }
  0x39   : > { %v1166_v2 = vld [vmem:[%s1153_s28] sm:$0xff]  ;;  %v268_v3 = vsel %vm259_vm0, %v1163_v1, 0.0  ;;  %v1171_v4 = vld [vmem:[%s1153_s28 + $0x8] sm:$0xff]  ;;  %v1174_v5 = vld [vmem:[%s1153_s28 + $0x30] sm:$0xff]  ;;  %805 = vmatprep.subr.bf16.mxu0 %v1006_v32  ;;  %v1008_v33 = vmov 0.0   ;;  %vm302_vm2 = vcmask 523264  }
  0x3a   : > { %v1177_v6 = vld [vmem:[%s1153_s28 + $0x38] sm:$0xff]  ;;  %v269_v7 = vadd.f32 %v268_v3, %v1160_v0  ;;  %v260_v8 = vsel %vm259_vm0, %v1171_v4, 0.0  ;;  %v1185_v10 = vld [vmem:[%s1153_s28 + $0x10] sm:$0xff]  ;;  %v1197_v15 = vld [vmem:[%s1153_s28 + $0x48] sm:$0xff]  ;;  %788 = vmatprep.mubr.msk.f32.mxu0 %vm1007_vm1, %v1008_v33  ;;  %vm392_vm3 = vcmask 64512   ;;  %s1299_s10 = scalar_lea.vmem [#allocation5], %s736_s25 }
  0x3b   : > { %v272_v9 = vsel %vm259_vm0, %v1177_v6, 0.0  ;;  %v1188_v11 = vld [vmem:[%s1153_s28 + $0x18] sm:$0xff]  ;;  %v261_v12 = vadd.f32 %v260_v8, %v1166_v2  ;;  %v1202_v18 = vld [vmem:[%s1153_s28 + $0x50] sm:$0xff]  ;;  %v1207_v20 = vld [vmem:[%s1153_s28 + $0x40] sm:$0xff]  ;;  %v276_v21 = vsel %vm259_vm0, %v1197_v15, 0.0  ;;  %s753_s25 = sshll.u32 %s1064_s22, 11 }
  0x3c   : > { %v264_v13 = vsel %vm259_vm0, %v1188_v11, 0.0  ;;  %v1194_v14 = vld [vmem:[%s1153_s28 + $0x58] sm:$0xff]  ;;  %270 = vadd.xlane.f32.xlu1 %v269_v7  ;;  %v273_v16 = vadd.f32 %v272_v9, %v1174_v5  ;;  %v1215_v23 = vld [vmem:[%s1153_s28 + $0x68] sm:$0xff]  ;;  %v277_v25 = vadd.f32 %v276_v21, %v1207_v20  ;;  %v1220_v26 = vld [vmem:[%s1153_s28 + $0x70] sm:$0xff]  ;;  %v1009_v9 = vmov 0   ;;  %s656_s11 = sshll.u32 %s1299_s10, 4  ;;  %s1337_s26 = scalar_lea.hbm %s1393_s5, %s753_s25  ;;  %s1339_s11 = int_to_ptr.vmem [resolvable:$true] %s656_s11 }
  0x3d   : > { %262 = vadd.xlane.f32.xlu0 %v261_v12  ;;  %v265_v17 = vadd.f32 %v264_v13, %v1185_v10  ;;  %v280_v19 = vsel %vm259_vm0, %v1194_v14, 0.0  ;;  %v1212_v22 = vld [vmem:[%s1153_s28 + $0x78] sm:$0xff]  ;;  %v1225_v28 = vld [vmem:[%s1153_s28 + $0x60] sm:$0xff]  ;;  %v284_v29 = vsel %vm259_vm0, %v1215_v23, 0.0  ;;  %v377_v60 = vld [vmem:[%s1391_s3 + $0x8] sm:$0xff]  ;;  %872 = vset.pattern.permute.xlu1 %v1009_v9  ;;  %s643_s22 = scalar_lea.sflag [#allocation4], %s1147_s23 }
  0x3e   : > { %v281_v24 = vadd.f32 %v280_v19, %v1202_v18  ;;  %v288_v27 = vsel %vm259_vm0, %v1212_v22, 0.0  ;;  %v285_v31 = vadd.f32 %v284_v29, %v1225_v28  ;;  %v300_v54 = vld [vmem:[%s1389_s1] sm:$0xff]  ;;  %v378_v61 = vld [vmem:[%s1391_s3 + $0x10] sm:$0xff]  ;;  %v379_v62 = vld [vmem:[%s1391_s3 + $0x18] sm:$0xff]  ;;  %871 = vset.pattern.permute.xlu0 %v1009_v9  ;;  %s935_s28 = scalar_lea.vmem %s1339_s11, 2048  ;;  %p1400_p11 = scmp.ne.s32.totalorder %s1397_s30, 0 }
  0x3f   : > { %v289_v30 = vadd.f32 %v288_v27, %v1220_v26  ;;  %v376_v55 = vld [vmem:[%s1391_s3] sm:$0xff]  ;;  %v381_v3 = vld [vmem:[%s1391_s3 + $0x28] sm:$0xff]  ;;  %v382_v7 = vld [vmem:[%s1391_s3 + $0x30] sm:$0xff]  ;;  %p936_p6 = scmp.ne.s32.totalorder %s1339_s11, %s935_s28  ;;  %s1010_s29 = smov [#allocation5]  }
  0x40   : > { %274 = vadd.xlane.f32.xlu1 %v273_v16  ;;  %793 = vmatprep.mubr.msk.f32.mxu1 %vm392_vm3, %v376_v55  ;;  %v301_v56 = vld [vmem:[%s1390_s2] sm:$0xff]  ;;  %v383_v8 = vld [vmem:[%s1391_s3 + $0x38] sm:$0xff]  ;;  %v385_v12 = vld [vmem:[%s1392_s4 + $0x8] sm:$0xff]  ;;  %s939_s12 = sshll.u32 %s1010_s29, 4  ;;  %s940_s12 = int_to_ptr.vmem [resolvable:$false] %s939_s12 }
  0x41   : > { %266 = vadd.xlane.f32.xlu0 %v265_v17  ;;  %v380_v63 = vld [vmem:[%s1391_s3 + $0x20] sm:$0xff]  ;;  %v386_v27 = vld [vmem:[%s1392_s4 + $0x10] sm:$0xff]  ;;  %p937_p12 = pnand %p936_p6, %p1400_p11  ;;  %s941_s14 = scalar_lea.vmem %s940_s12, 4096 }
  0x42   : > { %v384_v13 = vld [vmem:[%s1392_s4] sm:$0xff]  ;;  %p942_p8 = scmp.lt.s32.totalorder %s1339_s11, %s940_s12  ;;  %p943_p10 = scmp.lt.s32.totalorder %s941_s14, %s935_s28 }
  0x43   : > { %p938_p13 = pneg %p937_p12 }
  0x44   : > { %282 = vadd.xlane.f32.xlu1 %v281_v24  ;;  %v387_v24 = vld [vmem:[%s1392_s4 + $0x18] sm:$0xff]  ;;  %p944_p0 = por %p943_p10, %p942_p8 }
  0x45   : > { %278 = vadd.xlane.f32.xlu0 %v277_v25 }
  0x46   : > { %p945_p2 = pnand %p944_p0, %p938_p13 }
  0x48   : > { %290 = vadd.xlane.f32.xlu1 %v289_v30 }
  0x49   : > { %286 = vadd.xlane.f32.xlu0 %v285_v31 }
  0xc9   : > { %v271_v34 = vpop.xlane.xlu1 %270 }
  0xca   : > { %v263_v35 = vpop.xlane.xlu0 %262  ;;  %v294_v40 = vmul.f32 0.005291005, %v271_v34 }
  0xcb   : > { %v292_v38 = vmul.f32 0.005291005, %v263_v35 }
  0xcd   : > { %v275_v36 = vpop.xlane.xlu1 %274 }
  0xce   : > { %v267_v37 = vpop.xlane.xlu0 %266  ;;  %v295_v41 = vmul.f32 0.005291005, %v275_v36  ;;  %v389_v36 = vld [vmem:[%s1392_s4 + $0x28] sm:$0xff] }
  0xcf   : > { %v293_v39 = vmul.f32 0.005291005, %v267_v37 }
  0xd0   : > { %v809_v47 = vpack.c.bf16 %v295_v41, %v294_v40 }
  0xd1   : > { %v806_v42 = vpack.c.bf16 %v293_v39, %v292_v38  ;;  %v283_v43 = vpop.xlane.xlu1 %282  ;;  %v388_v38 = vld [vmem:[%s1392_s4 + $0x20] sm:$0xff] }
  0xd2   : > { %v279_v44 = vpop.xlane.xlu0 %278  ;;  %v297_v45 = vmul.f32 0.005291005, %v283_v43 }
  0xd3   : > { %807 = vmatpush3.bf16.msra.mxu0 %v806_v42  ;;  %v296_v46 = vmul.f32 0.005291005, %v279_v44 }
  0xd4   : > { %808 = vmatprep.subr.bf16.mxu0 %v1006_v32 }
  0xd5   : > { %v291_v48 = vpop.xlane.xlu1 %290  ;;  %v812_v50 = vpack.c.bf16 %v297_v45, %v296_v46 }
  0xd6   : > { %v287_v49 = vpop.xlane.xlu0 %286  ;;  %v299_v51 = vmul.f32 0.005291005, %v291_v48 }
  0xd7   : > { %810 = vmatpush3.bf16.msra.mxu0 %v809_v47  ;;  %v298_v52 = vmul.f32 0.005291005, %v287_v49  ;;  %v390_v47 = vld [vmem:[%s1392_s4 + $0x30] sm:$0xff]  ;;  %v391_v49 = vld [vmem:[%s1392_s4 + $0x38] sm:$0xff] }
  0xd8   : > { %811 = vmatprep.subr.bf16.mxu0 %v1006_v32 }
  0xd9   : > { %v815_v53 = vpack.c.bf16 %v299_v51, %v298_v52 }
  0xdb   : > { %813 = vmatpush3.bf16.msra.mxu0 %v812_v50 }
  0xdc   : > { %814 = vmatprep.subr.bf16.mxu0 %v1006_v32 }
  0xdf   : > { %816 = vmatpush3.bf16.msra.mxu0 %v815_v53 }
  0xe2   : > { %789 = vmatmul.mubr.msk.f32.vlgmr.msra.gmra.mrb[0].mxu0 %vm302_vm2, %v300_v54 }
 0x1b5   : > { %v372_v57 = vpop.f32.mrb[0].mxu0 }
 0x1b6   : > { %v373_v58 = vadd.f32 %v372_v57, %v301_v56  ;;  %v790_v59 = vpop.f32.mrb[1].mxu0 }
 0x1b8   : > { %791 = vmatprep.subr.mxu1 %v373_v58 }
 0x1b9   : > { %792 = vmatpush3.msra.mxu1 %v373_v58 }
 0x1ba   : > { %794 = vmatmul.mubr.msk.f32.vlgmr.msra.gmra.mrb[0].mxu1 %vm392_vm3, %v377_v60 }
 0x1bb   : > { %796 = vmatprep.mubr.msk.f32.mxu1 %vm392_vm3, %v378_v61 }
 0x1be   : > { %797 = vmatmul.mubr.msk.f32.gmra.mrb[2].mxu1 %vm392_vm3, %v379_v62 }
 0x1bf   : > { %799 = vmatprep.mubr.msk.f32.mxu1 %vm392_vm3, %v380_v63 }
 0x1c2   : > { %800 = vmatmul.mubr.msk.f32.gmra.mrb[4].mxu1 %vm392_vm3, %v381_v3 }
 0x1c3   : > { %802 = vmatprep.mubr.msk.f32.mxu1 %vm392_vm3, %v382_v7 }
 0x1c6   : > { %803 = vmatmul.mubr.msk.f32.gmra.mrb[6].mxu1 %vm392_vm3, %v383_v8 }
 0x28d   : > { %v795_v16 = vpop.f32.mrb[0].mxu1 }
 0x28e   : > { %v489_v17 = vadd.f32 %v795_v16, %v385_v12  ;;  %v483_v19 = vpop.f32.mrb[1].mxu1 }
 0x28f   : > { %v484_v21 = vadd.f32 %v483_v19, %v384_v13 }
 0x290   : > { %v523_v25 = vsub.f32 0.0, %v489_v17 }
 0x291   : > { %v522_v29 = vsub.f32 0.0, %v484_v21  ;;  %v798_v30 = vpop.f32.mrb[2].mxu1 }
 0x292   : > { %v532_v31 = vmul.f32 1.442695, %v523_v25  ;;  %v499_v32 = vadd.f32 %v798_v30, %v387_v24  ;;  %v493_v33 = vpop.f32.mrb[3].mxu1 }
 0x293   : > { %v530_v34 = vmul.f32 1.442695, %v522_v29  ;;  %v494_v35 = vadd.f32 %v493_v33, %v386_v27 }
 0x294   : > { %873 = vpow2.f32 %v532_v31  ;;  %v525_v37 = vsub.f32 0.0, %v499_v32 }
 0x295   : > { %875 = vpow2.f32 %v530_v34  ;;  %v524_v39 = vsub.f32 0.0, %v494_v35  ;;  %v801_v40 = vpop.f32.mrb[4].mxu1 }
 0x296   : > { %v536_v41 = vmul.f32 1.442695, %v525_v37  ;;  %v509_v42 = vadd.f32 %v801_v40, %v389_v36  ;;  %v503_v43 = vpop.f32.mrb[5].mxu1 }
 0x297   : > { %v534_v44 = vmul.f32 1.442695, %v524_v39  ;;  %v504_v45 = vadd.f32 %v503_v43, %v388_v38 }
 0x298   : > { %877 = vpow2.f32 %v536_v41  ;;  %v527_v46 = vsub.f32 0.0, %v509_v42 }
 0x299   : > { %879 = vpow2.f32 %v534_v44  ;;  %v526_v48 = vsub.f32 0.0, %v504_v45  ;;  %v804_v50 = vpop.f32.mrb[6].mxu1 }
 0x29a   : > { %v540_v51 = vmul.f32 1.442695, %v527_v46  ;;  %v513_v52 = vpop.f32.mrb[7].mxu1  ;;  %v519_v55 = vadd.f32 %v804_v50, %v391_v49 }
 0x29b   : > { %v514_v53 = vadd.f32 %v513_v52, %v390_v47  ;;  %v538_v54 = vmul.f32 1.442695, %v526_v48 }
 0x29c   : > { %881 = vpow2.f32 %v540_v51  ;;  %v529_v62 = vsub.f32 0.0, %v519_v55 }
 0x29d   : > { %v528_v56 = vsub.f32 0.0, %v514_v53  ;;  %883 = vpow2.f32 %v538_v54 }
 0x29e   : > { %v874_v57 = vpop.eup %873  ;;  %v544_v8 = vmul.f32 1.442695, %v529_v62 }
 0x29f   : > { %v876_v58 = vpop.eup %875  ;;  %v547_v59 = vadd.f32 1.0, %v874_v57  ;;  %v542_v60 = vmul.f32 1.442695, %v528_v56 }
 0x2a0   : > { %v546_v61 = vadd.f32 1.0, %v876_v58 }
 0x2a1   : > { %885 = vrcp.f32 %v547_v59 }
 0x2a2   : > { %v878_v63 = vpop.eup %877  ;;  %887 = vrcp.f32 %v546_v61 }
 0x2a3   : > { %v880_v3 = vpop.eup %879  ;;  %v549_v7 = vadd.f32 1.0, %v878_v63  ;;  %889 = vpow2.f32 %v542_v60 }
 0x2a4   : > { %v548_v9 = vadd.f32 1.0, %v880_v3 }
 0x2a5   : > { %891 = vrcp.f32 %v549_v7 }
 0x2a6   : > { %v882_v12 = vpop.eup %881  ;;  %893 = vpow2.f32 %v544_v8 }
 0x2a7   : > { %v551_v13 = vadd.f32 1.0, %v882_v12  ;;  %895 = vrcp.f32 %v548_v9  ;;  %v884_v16 = vpop.eup %883 }
 0x2a8   : > { %v550_v24 = vadd.f32 1.0, %v884_v16 }
 0x2a9   : > { %897 = vrcp.f32 %v551_v13 }
 0x2aa   : > { %899 = vrcp.f32 %v550_v24 }
 0x2ab   : > { %v886_v17 = vpop.eup %885 }
 0x2ac   : > { %v888_v19 = vpop.eup %887  ;;  %577 = vperm.xlu1 %872, %v886_v17  }
 0x2ad   : > { %v890_v21 = vpop.eup %889  ;;  %572 = vperm.xlu0 %871, %v888_v19  }
 0x2ae   : > { %v552_v27 = vadd.f32 1.0, %v890_v21 }
 0x2af   : > { %v892_v25 = vpop.eup %891 }
 0x2b0   : > { %587 = vperm.xlu1 %872, %v892_v25   ;;  %v894_v29 = vpop.eup %893  ;;  %901 = vrcp.f32 %v552_v27 }
 0x2b1   : > { %v896_v30 = vpop.eup %895  ;;  %v553_v32 = vadd.f32 1.0, %v894_v29 }
 0x2b3   : > { %v898_v31 = vpop.eup %897  ;;  %903 = vrcp.f32 %v553_v32 }
 0x2b4   : > { %582 = vperm.xlu1 %872, %v896_v30   ;;  %v900_v33 = vpop.eup %899 }
 0x2b8   : > { %597 = vperm.xlu1 %872, %v898_v31  }
 0x2ba   : > { %v902_v34 = vpop.eup %901 }
 0x2bc   : > { %592 = vperm.xlu1 %872, %v900_v33  }
 0x2bd   : > { %v904_v35 = vpop.eup %903 }
 0x2c0   : > { %602 = vperm.xlu1 %872, %v902_v34  }
 0x2c4   : > { %607 = vperm.xlu1 %872, %v904_v35  }
 0x32b   : > { %v578_v36 = vpop.permute.xlu1 %577 }
 0x32c   : > { %v612_v37 = vmul.f32 %v578_v36, %v1185_v10  ;;  %v613_v38 = vmul.f32 %v578_v36, %v1188_v11  ;;  %v573_v39 = vpop.permute.xlu0 %572 }
 0x32d   : > { %v610_v40 = vmul.f32 %v573_v39, %v1166_v2  ;;  %v611_v41 = vmul.f32 %v573_v39, %v1171_v4 }
 0x32e   : > { %628 = vst [vmem:[%s1299_s10 + $0x10] sm:$0xff] %v612_v37  ;;  %629 = vst.msk [vmem:[%s1299_s10 + $0x18] sm:$0xff] %vm259_vm0, %v613_v38 }
 0x32f   : > { %626 = vst [vmem:[%s1299_s10] sm:$0xff] %v610_v40  ;;  %627 = vst.msk [vmem:[%s1299_s10 + $0x8] sm:$0xff] %vm259_vm0, %v611_v41  ;;  %v588_v2 = vpop.permute.xlu1 %587 }
 0x330   : > { %v616_v4 = vmul.f32 %v588_v2, %v1174_v5  ;;  %v617_v10 = vmul.f32 %v588_v2, %v1177_v6 }
 0x332   : > { %632 = vst [vmem:[%s1299_s10 + $0x30] sm:$0xff] %v616_v4  ;;  %633 = vst.msk [vmem:[%s1299_s10 + $0x38] sm:$0xff] %vm259_vm0, %v617_v10 }
 0x333   : > { %v583_v11 = vpop.permute.xlu1 %582 }
 0x334   : > { %v614_v42 = vmul.f32 %v583_v11, %v1160_v0  ;;  %v615_v43 = vmul.f32 %v583_v11, %v1163_v1 }
 0x336   : > { %630 = vst [vmem:[%s1299_s10 + $0x20] sm:$0xff] %v614_v42  ;;  %631 = vst.msk [vmem:[%s1299_s10 + $0x28] sm:$0xff] %vm259_vm0, %v615_v43 }
 0x337   : > { %v598_v44 = vpop.permute.xlu1 %597 }
 0x338   : > { %v620_v5 = vmul.f32 %v598_v44, %v1202_v18  ;;  %v621_v6 = vmul.f32 %v598_v44, %v1194_v14 }
 0x33a   : > { %636 = vst [vmem:[%s1299_s10 + $0x50] sm:$0xff] %v620_v5  ;;  %637 = vst.msk [vmem:[%s1299_s10 + $0x58] sm:$0xff] %vm259_vm0, %v621_v6 }
 0x33b   : > { %v593_v45 = vpop.permute.xlu1 %592 }
 0x33c   : > { %v618_v0 = vmul.f32 %v593_v45, %v1207_v20  ;;  %v619_v1 = vmul.f32 %v593_v45, %v1197_v15 }
 0x33e   : > { %634 = vst [vmem:[%s1299_s10 + $0x40] sm:$0xff] %v618_v0  ;;  %635 = vst.msk [vmem:[%s1299_s10 + $0x48] sm:$0xff] %vm259_vm0, %v619_v1 }
 0x33f   : > { %v603_v46 = vpop.permute.xlu1 %602 }
 0x340   : > { %v622_v47 = vmul.f32 %v603_v46, %v1225_v28  ;;  %v623_v14 = vmul.f32 %v603_v46, %v1215_v23 }
 0x342   : > { %638 = vst [vmem:[%s1299_s10 + $0x60] sm:$0xff] %v622_v47  ;;  %639 = vst.msk [vmem:[%s1299_s10 + $0x68] sm:$0xff] %vm259_vm0, %v623_v14 }
 0x343   : > { %v608_v18 = vpop.permute.xlu1 %607 }
 0x344   : > { %v624_v15 = vmul.f32 %v608_v18, %v1220_v26  ;;  %v625_v20 = vmul.f32 %v608_v18, %v1212_v22 }
 0x346   : > { %640 = vst [vmem:[%s1299_s10 + $0x70] sm:$0xff] %v624_v15  ;;  %641 = vst.msk [vmem:[%s1299_s10 + $0x78] sm:$0xff] %vm259_vm0, %v625_v20 }
 0x347   : > { %948 = shalt.err (!%p945_p2)
}
 0x348   : > { %s949_s15 = scalar_lea.hbm %s1337_s26, 2048  ;;  %s953_s7 = scalar_lea.hbm %s1393_s5, 4096 }
 0x349   : > { %p950_p4 = scmp.ne.s32.totalorder %s1337_s26, %s949_s15  ;;  %p954_p9 = scmp.lt.u32.totalorder %s1337_s26, %s1393_s5 }
 0x34a   : > { %p955_p1 = scmp.lt.u32.totalorder %s953_s7, %s949_s15  ;;  %p957_p6 = scmp.lt.u32.totalorder %s949_s15, %s1337_s26 }
 0x34b   : > { %p951_p5 = pnand %p950_p4, %p1400_p11 }
 0x34c   : > { %p956_p3 = por %p955_p1, %p954_p9 }
 0x34d   : > { %p952_p7 = pneg %p951_p5 }
 0x34e   : > { %p958_p12 = por %p957_p6, %p956_p3 }
 0x350   : > { %p959_p13 = pnand %p958_p12, %p952_p7 }
 0x352   : > { %962 = shalt.err (!%p959_p13)
}
 0x353   : > { %s1011_s25 = smov 256   ;;  %s1012_s13 = smov 16  }
 0x354   : > { %819 = dma.vmem_to_hbm [thread:$0]  (%p1400_p11), %s1339_s11, 2048, %s1337_s26, %s643_s22, %s1011_s25, %s1011_s25, %s1012_s13  }
 0x355 PF: > { %s671_s17 = sand.u32 1, %s989_s18   ;;  %p1401_p8 = scmp.ne.s32.totalorder %s1398_s6, 0 }
 0x356   : > { %p1402_p10 = scmp.ge.s32.totalorder %s1001_s21, 2  ;;  %s672_s28 = scalar_lea.sflag [#allocation4], %s671_s17 }
 0x358   : > { %p826_p0 = pnand %p1402_p10, %p1401_p8 }
 0x35a   : > { %984 = dma.done.wait (!%p826_p0), %s672_s28, 2048  }
 0x35b   : > { %986 = vsyncadd (!%p826_p0), %s672_s28, 4294965248  ;;  %p18_p2 = scmp.ge.s32.totalorder %s1068_s24, 4   ;;  %s1403_s18 = smov %s993_s19 }
 0x35c   : > { %s1404_s19 = smov %s997_s20  ;;  %s1405_s20 = smov %s1080_s27 }
 0x35d   : > { %s1406_s21 = smov %s1068_s24  ;;  %20 = sbr.rel (!%p18_p2) target bundleno = 5 (0x5), region = 85 }
 0x364   :  { %677 = vsyncpa [#allocation3], 1 }
 0x365   :  { %679 = vsyncpa [#allocation3 + $0x1], 1 }
 0x366   :  { %680 = vsyncpa [#allocation4], 1 }
 0x367   :  { %682 = vsyncpa [#allocation4 + $0x1], 1 }

</bundles_post_ra>
